<compile_context>
chip_gen: v6e
topology: v6e:2x2x1
jax: 0.10.0
libtpu: 0.0.40
codegen_flags: <defaults>
</compile_context>

<pallas_src>
import functools

import jax
import jax.numpy as jnp
from jax.experimental import pallas as pl
from jax.experimental.pallas import tpu as pltpu

LANES = 128


def _bce_mean_ref(p, t):
    """Pure-JAX reference of torch.nn.functional.binary_cross_entropy (mean)."""
    p = p.astype(jnp.float32)
    t = t.astype(jnp.float32)
    return -jnp.mean(
        t * jnp.maximum(jnp.log(p), -100.0)
        + (1.0 - t) * jnp.maximum(jnp.log(1.0 - p), -100.0)
    )


def _pick_sub_rows(block_rows):
    """Largest sub-tile row count <= 128 that divides block_rows (block_rows % 8 == 0)."""
    for s in (128, 64, 32, 16, 8):
        if block_rows % s == 0:
            return s
    return block_rows


def _bce_sum_kernel(p_ref, t_ref, out_ref, acc_ref, *, sub_rows, block_rows,
                    valid_rows, need_mask, hard_targets):
    """Accumulate (un-negated) log-likelihood partial sums for one (block_rows, 128) tile.

    Matches torch BCE semantics: sum of  t*clamp(log p, -100) + (1-t)*clamp(log(1-p), -100).
    The negate and 1/n are applied once in the wrapper.
    """
    o = pl.program_id(0)                 # core-parallel axis
    i = pl.program_id(1)                 # sequential reduction axis
    nb_inner = pl.num_programs(1)

    @pl.when(i == 0)
    def _():
        acc_ref[...] = jnp.zeros_like(acc_ref)

    # Unclamped linear block index -> global row offset (the DMA index_map is clamped,
    # so out-of-range steps re-read a valid block but are fully masked out here).
    base_row = (o * nb_inner + i) * block_rows
    n_sub = block_rows // sub_rows

    if need_mask:
        # Hoisted loop-invariant iota (JAX does not CSE broadcast_in_dim in loops).
        row_ids = jax.lax.broadcasted_iota(jnp.int32, (sub_rows, LANES), 0)

    def body(s, carry):
        r0 = pl.multiple_of(s * sub_rows, sub_rows)
        p = p_ref[pl.ds(r0, sub_rows), :].astype(jnp.float32)
        t = t_ref[pl.ds(r0, sub_rows), :].astype(jnp.float32)
        # NOTE: the -100 clamp MUST happen before combining with t / (1-t); padded and
        # masked elements would otherwise produce 0 * (-inf) = NaN.
        if hard_targets:
            # One transcendental per element; valid only for hard {0,1} targets.
            ll = jnp.maximum(jnp.log(jnp.where(t >= 0.5, p, 1.0 - p)), -100.0)
        else:
            log_p = jnp.maximum(jnp.log(p), -100.0)
            log_1mp = jnp.maximum(jnp.log(1.0 - p), -100.0)
            # == t*log(p) + (1-t)*log(1-p), with one fewer multiply / live vreg.
            ll = log_1mp + t * (log_p - log_1mp)
        if need_mask:
            # Zero out rows past the true element count (garbage-padded final block
            # and any fully out-of-range step of the core-parallel split).
            limit = valid_rows - base_row - r0
            ll = jnp.where(row_ids < limit, ll, 0.0)
        # Fold (sub_rows, 128) -> (8, 128): pure VPU vreg adds into the accumulator.
        acc_ref[...] += ll.reshape(-1, 8, LANES).sum(axis=0)
        return carry

    jax.lax.fori_loop(0, n_sub, body, 0, unroll=min(n_sub, 8))

    @pl.when(i == nb_inner - 1)
    def _():
        # Dump this core's (8, 128) partial sums; final reduce happens in the wrapper.
        out_ref[...] = acc_ref[...]


@functools.partial(jax.jit, static_argnames=("block_rows", "hard_targets"))
def bce_mean_pallas(predictions_2, targets_2, block_rows=8192, hard_targets=False):
    """Mean BCE via a gridded Pallas reduction kernel (any shape, any real dtype)."""
    total = predictions_2.size

    # Tiny-input bypass: fixed pallas_call overhead dominates below a few KiB.
    if total < 32 * LANES:
        return _bce_mean_ref(predictions_2, targets_2)

    p = predictions_2.reshape(-1)
    t = targets_2.reshape(-1)
    rem = total % LANES
    if rem:
        # Rare path (size not a multiple of 128): pad < 128 inert elements
        # (p=1, t=1 -> clamped BCE contribution exactly 0).  The common aligned case
        # does zero host-side copies.
        pad = LANES - rem
        p = jnp.pad(p, (0, pad), constant_values=1.0)
        t = jnp.pad(t, (0, pad), constant_values=1.0)
    rows = p.size // LANES
    p2 = p.reshape(rows, LANES)   # free reshape; original dtype kept (bf16 halves HBM bytes)
    t2 = t.reshape(rows, LANES)

    # Sublane alignment of the block's second-minor dim: 8 for 32-bit, 16 for 16-bit,
    # 32 for 8-bit inputs (packed-layout requirement on multi-block grids).
    align = 8
    for dt in (p2.dtype, t2.dtype):
        align = max(align, 32 // max(dt.itemsize, 1))

    block_rows = max(align, min(int(block_rows), rows))
    block_rows = (block_rows // align) * align          # <= rows, multiple of align
    sub_rows = _pick_sub_rows(block_rows)
    nb = pl.cdiv(rows, block_rows)
    n_split = 2 if nb >= 2 else 1                       # feed both v7x TensorCores
    nb_inner = pl.cdiv(nb, n_split)
    need_mask = (n_split * nb_inner * block_rows) != rows

    def in_index_map(o, i):
        lin = o * nb_inner + i
        # Clamp so a core's trailing (fully masked) step never DMAs out of bounds.
        return (jnp.minimum(lin, nb - 1), 0)

    kernel = functools.partial(
        _bce_sum_kernel,
        sub_rows=sub_rows,
        block_rows=block_rows,
        valid_rows=rows,
        need_mask=need_mask,
        hard_targets=hard_targets,
    )

    partials = pl.pallas_call(
        kernel,
        out_shape=jax.ShapeDtypeStruct((n_split * 8, LANES), jnp.float32),
        grid=(n_split, nb_inner),
        in_specs=[
            pl.BlockSpec((block_rows, LANES), in_index_map),
            pl.BlockSpec((block_rows, LANES), in_index_map),
        ],
        out_specs=pl.BlockSpec((8, LANES), lambda o, i: (o, 0)),
        scratch_shapes=[pltpu.VMEM((8, LANES), jnp.float32)],
        compiler_params=pltpu.CompilerParams(
            dimension_semantics=("parallel", "arbitrary"),
            vmem_limit_bytes=32 << 20,
        ),
        cost_estimate=pl.CostEstimate(
            flops=6 * total,
            transcendentals=(1 if hard_targets else 2) * total,
            bytes_accessed=p2.size * p2.dtype.itemsize + t2.size * t2.dtype.itemsize,
        ),
    )(p2, t2)

    # Final tiny cross-lane reduce, mean and negate (folded out of the kernel).
    return -jnp.sum(partials) / total


class CombinedLoss:
    """JAX port of the PyTorch CombinedLoss module."""

    def __init__(self, weight_topological=0.005, weight_topological_radius=0.0025):
        self.weight_topological = weight_topological

    def __call__(self, predictions, targets, predictions_2, targets_2):
        bce_loss = bce_mean_pallas(predictions_2, targets_2)
        # TODO(synk): topo_loss requires gudhi CubicalComplex persistent homology +
        # Wasserstein distance on persistence diagrams (host-side, data-dependent
        # combinatorics); no Pallas equivalent, so the topological term is 0 here.
        topoloss = jnp.float32(0.0)
        combined_loss = bce_loss + self.weight_topological * topoloss
        return bce_loss, combined_loss


if __name__ == "__main__":
    key = jax.random.PRNGKey(0)
    k1, k2, k3, k4 = jax.random.split(key, 4)

    B, C, H, W = 2, 1, 64, 64  # NCHW, binary segmentation-style images

    # predictions / targets feed the (untranslatable) topological term.
    predictions = jax.random.uniform(k1, (B, C, H, W), dtype=jnp.float32)
    targets = (jax.random.uniform(k2, (B, C, H, W)) > 0.5).astype(jnp.float32)

    # predictions_2 must be probabilities in (0, 1) for BCE.
    predictions_2 = jax.nn.sigmoid(jax.random.normal(k3, (B, C, H, W), dtype=jnp.float32))
    targets_2 = (jax.random.uniform(k4, (B, C, H, W)) > 0.5).astype(jnp.float32)

    loss_fn = CombinedLoss(weight_topological=0.005)
    bce_loss, combined_loss = loss_fn(predictions, targets, predictions_2, targets_2)
    jax.block_until_ready(bce_loss)
    jax.block_until_ready(combined_loss)

    ref = _bce_mean_ref(predictions_2, targets_2)
    assert jnp.allclose(bce_loss, ref, rtol=1e-5, atol=1e-6), (bce_loss, ref)
    assert jnp.allclose(combined_loss, ref, rtol=1e-5, atol=1e-6), (combined_loss, ref)

    # Multi-block grid + ragged final block masking + dual-core split path.
    k5, k6 = jax.random.split(k3)
    big_p = jax.nn.sigmoid(jax.random.normal(k5, (2, 1, 200, 200), dtype=jnp.float32))
    big_t = (jax.random.uniform(k6, (2, 1, 200, 200)) > 0.5).astype(jnp.float32)
    big_ref = _bce_mean_ref(big_p, big_t)

    big_bce = bce_mean_pallas(big_p, big_t, block_rows=128)
    jax.block_until_ready(big_bce)
    assert jnp.allclose(big_bce, big_ref, rtol=1e-5, atol=1e-6), (big_bce, big_ref)

    # Default (large-block) configuration on the same input (single ragged block).
    big_bce_default = bce_mean_pallas(big_p, big_t)
    jax.block_until_ready(big_bce_default)
    assert jnp.allclose(big_bce_default, big_ref, rtol=1e-5, atol=1e-6)

    # Single-log fast path: identical result for hard {0,1} targets.
    big_bce_hard = bce_mean_pallas(big_p, big_t, block_rows=128, hard_targets=True)
    jax.block_until_ready(big_bce_hard)
    assert jnp.allclose(big_bce_hard, big_ref, rtol=1e-5, atol=1e-6)

    # bf16 inputs stream half the HBM bytes; kernel casts to f32 internally.
    bp16, bt16 = big_p.astype(jnp.bfloat16), big_t.astype(jnp.bfloat16)
    bf_bce = bce_mean_pallas(bp16, bt16, block_rows=256)
    jax.block_until_ready(bf_bce)
    bf_ref = _bce_mean_ref(bp16, bt16)
    assert jnp.allclose(bf_bce, bf_ref, rtol=1e-4, atol=1e-5), (bf_bce, bf_ref)

    print("KERNEL_OK")
</pallas_src>

<mosaic_0001>
module attributes {stable_mosaic.version = 11 : i64} {
  func.func @_bce_sum_kernel(%arg0: i32, %arg1: i32, %arg2: memref<64x128xf32, #tpu.memory_space<vmem>>, %arg3: memref<64x128xf32, #tpu.memory_space<vmem>>, %arg4: memref<8x128xf32, #tpu.memory_space<vmem>>, %arg5: memref<8x128xf32, #tpu.memory_space<vmem>>) attributes {dimension_semantics = [#tpu.dimension_semantics<parallel>, #tpu.dimension_semantics<arbitrary>], iteration_bounds = array<i64: 1, 1>, scalar_prefetch = 0 : i64, scratch_operands = 1 : i64, tpu.core_type = #tpu.core_type<tc>, window_params = [{transform_indices = @transform_0, window_bounds = array<i64: 64, 128>}, {transform_indices = @transform_1, window_bounds = array<i64: 64, 128>}, {transform_indices = @transform_2, window_bounds = array<i64: 8, 128>}]} {
    %c0_i32 = arith.constant 0 : i32
    %0 = arith.cmpi eq, %arg1, %c0_i32 : i32
    %1 = arith.extui %0 : i1 to i32
    %c0_i32_0 = arith.constant 0 : i32
    %2 = arith.cmpi ne, %1, %c0_i32_0 : i32
    scf.if %2 {
      %cst_12 = arith.constant 0.000000e+00 : f32
      %28 = vector.broadcast %cst_12 : f32 to vector<8x128xf32>
      %c0_13 = arith.constant 0 : index
      %c0_14 = arith.constant 0 : index
      %29 = vector.load %arg5[%c0_13, %c0_14] : memref<8x128xf32, #tpu.memory_space<vmem>>, vector<8x128xf32>
      tpu.vector_store %arg5[%c0_13, %c0_14], %28 {strides = array<i32>} : memref<8x128xf32, #tpu.memory_space<vmem>>, vector<8x128xf32>,
    } else {
    }
    %c0_i32_1 = arith.constant 0 : i32
    %c64_i32 = arith.constant 64 : i32
    %3 = arith.muli %c0_i32_1, %c64_i32 : i32
    %4 = tpu.assume_multiple %3, 64 : i32
    %5 = arith.index_cast %4 : i32 to index
    %c0 = arith.constant 0 : index
    %6 = vector.load %arg2[%5, %c0] : memref<64x128xf32, #tpu.memory_space<vmem>>, vector<64x128xf32>
    %7 = arith.index_cast %4 : i32 to index
    %c0_2 = arith.constant 0 : index
    %8 = vector.load %arg3[%7, %c0_2] : memref<64x128xf32, #tpu.memory_space<vmem>>, vector<64x128xf32>
    %9 = math.log %6 : vector<64x128xf32>
    %cst = arith.constant -1.000000e+02 : f32
    %10 = vector.broadcast %cst : f32 to vector<64x128xf32>
    %11 = arith.maximumf %9, %10 : vector<64x128xf32>
    %cst_3 = arith.constant 1.000000e+00 : f32
    %12 = vector.broadcast %cst_3 : f32 to vector<64x128xf32>
    %13 = arith.subf %12, %6 : vector<64x128xf32>
    %14 = math.log %13 : vector<64x128xf32>
    %cst_4 = arith.constant -1.000000e+02 : f32
    %15 = vector.broadcast %cst_4 : f32 to vector<64x128xf32>
    %16 = arith.maximumf %14, %15 : vector<64x128xf32>
    %17 = arith.subf %11, %16 : vector<64x128xf32>
    %18 = arith.mulf %8, %17 : vector<64x128xf32>
    %19 = arith.addf %16, %18 : vector<64x128xf32>
    %c0_5 = arith.constant 0 : index
    %c0_6 = arith.constant 0 : index
    %20 = vector.load %arg5[%c0_5, %c0_6] : memref<8x128xf32, #tpu.memory_space<vmem>>, vector<8x128xf32>
    %21 = vector.shape_cast %19 : vector<64x128xf32> to vector<8x8x128xf32>
    %cst_7 = arith.constant dense<0.000000e+00> : vector<8x128xf32>
    %22 = vector.multi_reduction <add>, %21, %cst_7 [0] : vector<8x8x128xf32> to vector<8x128xf32>
    %23 = arith.addf %20, %22 : vector<8x128xf32>
    %c0_8 = arith.constant 0 : index
    %c0_9 = arith.constant 0 : index
    %24 = vector.load %arg5[%c0_8, %c0_9] : memref<8x128xf32, #tpu.memory_space<vmem>>, vector<8x128xf32>
    tpu.vector_store %arg5[%c0_8, %c0_9], %23 {strides = array<i32>} : memref<8x128xf32, #tpu.memory_space<vmem>>, vector<8x128xf32>,
    %c1_i32 = arith.constant 1 : i32
    %c0_i32_10 = arith.constant 0 : i32
    %25 = arith.cmpi eq, %arg1, %c0_i32_10 : i32
    %26 = arith.extui %25 : i1 to i32
    %c0_i32_11 = arith.constant 0 : i32
    %27 = arith.cmpi ne, %26, %c0_i32_11 : i32
    scf.if %27 {
      %c0_12 = arith.constant 0 : index
      %c0_13 = arith.constant 0 : index
      %28 = vector.load %arg5[%c0_12, %c0_13] : memref<8x128xf32, #tpu.memory_space<vmem>>, vector<8x128xf32>
      %c0_14 = arith.constant 0 : index
      %c0_15 = arith.constant 0 : index
      %29 = vector.load %arg4[%c0_14, %c0_15] : memref<8x128xf32, #tpu.memory_space<vmem>>, vector<8x128xf32>
      tpu.vector_store %arg4[%c0_14, %c0_15], %28 {strides = array<i32>} : memref<8x128xf32, #tpu.memory_space<vmem>>, vector<8x128xf32>,
    } else {
    }
    return
  }
  func.func @transform_0(%arg0: i32, %arg1: i32) -> (i32, i32) {
    %c1_i32 = arith.constant 1 : i32
    %0 = arith.muli %arg0, %c1_i32 : i32
    %1 = arith.addi %0, %arg1 : i32
    %c0_i32 = arith.constant 0 : i32
    %2 = arith.minsi %1, %c0_i32 : i32
    %c0_i32_0 = arith.constant 0 : i32
    %c0_i32_1 = arith.constant 0 : i32
    return %2, %c0_i32_0 : i32, i32
  }
  func.func @transform_1(%arg0: i32, %arg1: i32) -> (i32, i32) {
    %c1_i32 = arith.constant 1 : i32
    %0 = arith.muli %arg0, %c1_i32 : i32
    %1 = arith.addi %0, %arg1 : i32
    %c0_i32 = arith.constant 0 : i32
    %2 = arith.minsi %1, %c0_i32 : i32
    %c0_i32_0 = arith.constant 0 : i32
    %c0_i32_1 = arith.constant 0 : i32
    return %2, %c0_i32_0 : i32, i32
  }
  func.func @transform_2(%arg0: i32, %arg1: i32) -> (i32, i32) {
    %c0_i32 = arith.constant 0 : i32
    %c0_i32_0 = arith.constant 0 : i32
    return %arg0, %c0_i32 : i32, i32
  }
}

</mosaic_0001>

<bundles_post_ra>
// kernel: bce_mean_pallas.1
= control target key start
LH: loop header
LB: loop body
LE: loop exit
PB: predicated region body
PF: predicated region fallthrough
CT: control target
= control target key end

     0   :  { %s305_s0 = inlined_call_operand.vmem [shape: f32[64,128], index: 0, kind: input, shape index: {}]   ;;  %s306_s1 = inlined_call_operand.vmem [shape: f32[64,128], index: 1, kind: input, shape index: {}]   ;;  %s307_s2 = inlined_call_operand.vmem [shape: f32[8,128], index: 2, kind: output, shape index: {}]  }
   0x1   :  { %v80_v0 = vld [vmem:[%s305_s0] sm:$0xff]  ;;  %v81_v1 = vld [vmem:[%s305_s0 + $0x8] sm:$0xff]  ;;  %v82_v2 = vld [vmem:[%s305_s0 + $0x10] sm:$0xff] }
   0x2   :  { %207 = vlog2.f32 %v80_v0  ;;  %v83_v3 = vld [vmem:[%s305_s0 + $0x18] sm:$0xff]  ;;  %v84_v4 = vld [vmem:[%s305_s0 + $0x20] sm:$0xff]  ;;  %v85_v5 = vld [vmem:[%s305_s0 + $0x28] sm:$0xff]  ;;  %v120_v6 = vsub.f32 1.0, %v80_v0  ;;  %v121_v8 = vsub.f32 1.0, %v81_v1  ;;  %v122_v10 = vsub.f32 1.0, %v82_v2 }
   0x3   :  { %209 = vlog2.f32 %v81_v1  ;;  %v86_v7 = vld [vmem:[%s305_s0 + $0x30] sm:$0xff]  ;;  %v87_v9 = vld [vmem:[%s305_s0 + $0x38] sm:$0xff]  ;;  %v123_v11 = vsub.f32 1.0, %v83_v3  ;;  %v124_v12 = vsub.f32 1.0, %v84_v4  ;;  %v125_v13 = vsub.f32 1.0, %v85_v5  ;;  %v88_v45 = vld [vmem:[%s306_s1] sm:$0xff] }
   0x4   :  { %211 = vlog2.f32 %v82_v2  ;;  %v126_v14 = vsub.f32 1.0, %v86_v7  ;;  %v127_v15 = vsub.f32 1.0, %v87_v9  ;;  %v89_v51 = vld [vmem:[%s306_s1 + $0x8] sm:$0xff]  ;;  %v90_v57 = vld [vmem:[%s306_s1 + $0x10] sm:$0xff]  ;;  %v91_v63 = vld [vmem:[%s306_s1 + $0x18] sm:$0xff] }
   0x5   :  { %213 = vlog2.f32 %v83_v3 }
   0x6   :  { %215 = vlog2.f32 %v84_v4  ;;  %v92_v4 = vld [vmem:[%s306_s1 + $0x20] sm:$0xff] }
   0x7   :  { %217 = vlog2.f32 %v85_v5 }
   0x8   :  { %219 = vlog2.f32 %v86_v7 }
   0x9   :  { %221 = vlog2.f32 %v87_v9  ;;  %v93_v9 = vld [vmem:[%s306_s1 + $0x28] sm:$0xff] }
   0xa   :  { %223 = vlog2.f32 %v120_v6 }
   0xb   :  { %225 = vlog2.f32 %v121_v8 }
   0xc   :  { %227 = vlog2.f32 %v122_v10 }
   0xd   :  { %229 = vlog2.f32 %v123_v11 }
   0xe   :  { %231 = vlog2.f32 %v124_v12 }
   0xf   :  { %v208_v16 = vpop.eup %207  ;;  %233 = vlog2.f32 %v125_v13 }
  0x10   :  { %v210_v17 = vpop.eup %209  ;;  %235 = vlog2.f32 %v126_v14  ;;  %v97_v22 = vmul.f32 0.6931472, %v208_v16 }
  0x11   :  { %v212_v18 = vpop.eup %211  ;;  %237 = vlog2.f32 %v127_v15  ;;  %v99_v24 = vmul.f32 0.6931472, %v210_v17 }
  0x12   :  { %v214_v19 = vpop.eup %213  ;;  %v101_v26 = vmul.f32 0.6931472, %v212_v18  ;;  %v112_v33 = vmax.f32 %v97_v22, -100.0  ;;  %v94_v18 = vld [vmem:[%s306_s1 + $0x30] sm:$0xff] }
  0x13   :  { %v216_v20 = vpop.eup %215  ;;  %v103_v27 = vmul.f32 0.6931472, %v214_v19  ;;  %v113_v37 = vmax.f32 %v99_v24, -100.0 }
  0x14   :  { %v218_v21 = vpop.eup %217  ;;  %v105_v29 = vmul.f32 0.6931472, %v216_v20  ;;  %v114_v40 = vmax.f32 %v101_v26, -100.0  ;;  %v95_v26 = vld [vmem:[%s306_s1 + $0x38] sm:$0xff] }
  0x15   :  { %v220_v23 = vpop.eup %219  ;;  %v107_v30 = vmul.f32 0.6931472, %v218_v21  ;;  %v115_v41 = vmax.f32 %v103_v27, -100.0 }
  0x16   :  { %v222_v25 = vpop.eup %221  ;;  %v109_v32 = vmul.f32 0.6931472, %v220_v23  ;;  %v116_v46 = vmax.f32 %v105_v29, -100.0 }
  0x17   :  { %v224_v28 = vpop.eup %223  ;;  %v111_v36 = vmul.f32 0.6931472, %v222_v25  ;;  %v117_v47 = vmax.f32 %v107_v30, -100.0 }
  0x18   :  { %v226_v31 = vpop.eup %225  ;;  %v129_v34 = vmul.f32 0.6931472, %v224_v28  ;;  %v118_v52 = vmax.f32 %v109_v32, -100.0 }
  0x19   :  { %v228_v35 = vpop.eup %227  ;;  %v131_v38 = vmul.f32 0.6931472, %v226_v31  ;;  %v119_v58 = vmax.f32 %v111_v36, -100.0 }
  0x1a   :  { %v230_v39 = vpop.eup %229  ;;  %v133_v42 = vmul.f32 0.6931472, %v228_v35  ;;  %v144_v43 = vmax.f32 %v129_v34, -100.0 }
  0x1b   :  { %v232_v44 = vpop.eup %231  ;;  %v135_v48 = vmul.f32 0.6931472, %v230_v39  ;;  %v145_v49 = vmax.f32 %v131_v38, -100.0 }
  0x1c   :  { %v234_v50 = vpop.eup %233  ;;  %v137_v53 = vmul.f32 0.6931472, %v232_v44  ;;  %v146_v54 = vmax.f32 %v133_v42, -100.0  ;;  %v152_v55 = vsub.f32 %v112_v33, %v144_v43 }
  0x1d   :  { %v236_v56 = vpop.eup %235  ;;  %v139_v59 = vmul.f32 0.6931472, %v234_v50  ;;  %v147_v60 = vmax.f32 %v135_v48, -100.0  ;;  %v153_v61 = vsub.f32 %v113_v37, %v145_v49 }
  0x1e   :  { %v238_v62 = vpop.eup %237  ;;  %v141_v0 = vmul.f32 0.6931472, %v236_v56  ;;  %v148_v1 = vmax.f32 %v137_v53, -100.0  ;;  %v154_v2 = vsub.f32 %v114_v40, %v146_v54  ;;  %v160_v3 = vmul.f32 %v152_v55, %v88_v45 }
  0x1f   :  { %v143_v5 = vmul.f32 0.6931472, %v238_v62  ;;  %v149_v6 = vmax.f32 %v139_v59, -100.0  ;;  %v155_v7 = vsub.f32 %v115_v41, %v147_v60  ;;  %v161_v8 = vmul.f32 %v153_v61, %v89_v51 }
  0x20   :  { %v150_v10 = vmax.f32 %v141_v0, -100.0  ;;  %v156_v11 = vsub.f32 %v116_v46, %v148_v1  ;;  %v162_v12 = vmul.f32 %v154_v2, %v90_v57  ;;  %v168_v13 = vadd.f32 %v160_v3, %v144_v43 }
  0x21   :  { %v151_v14 = vmax.f32 %v143_v5, -100.0  ;;  %v157_v15 = vsub.f32 %v117_v47, %v149_v6  ;;  %v163_v16 = vmul.f32 %v155_v7, %v91_v63  ;;  %v169_v17 = vadd.f32 %v161_v8, %v145_v49 }
  0x22   :  { %v158_v19 = vsub.f32 %v118_v52, %v150_v10  ;;  %v164_v20 = vmul.f32 %v156_v11, %v92_v4  ;;  %v170_v21 = vadd.f32 %v162_v12, %v146_v54 }
  0x23   :  { %v159_v22 = vsub.f32 %v119_v58, %v151_v14  ;;  %v165_v23 = vmul.f32 %v157_v15, %v93_v9  ;;  %v171_v24 = vadd.f32 %v163_v16, %v147_v60  ;;  %v177_v25 = vadd.f32 %v169_v17, %v168_v13 }
  0x24   :  { %v166_v27 = vmul.f32 %v158_v19, %v94_v18  ;;  %v172_v28 = vadd.f32 %v164_v20, %v148_v1 }
  0x25   :  { %v178_v29 = vadd.f32 %v177_v25, %v170_v21  ;;  %v167_v30 = vmul.f32 %v159_v22, %v95_v26  ;;  %v173_v31 = vadd.f32 %v165_v23, %v149_v6 }
  0x26   :  { %v174_v33 = vadd.f32 %v166_v27, %v150_v10 }
  0x27   :  { %v179_v32 = vadd.f32 %v178_v29, %v171_v24  ;;  %v175_v35 = vadd.f32 %v167_v30, %v151_v14 }
  0x29   :  { %v180_v34 = vadd.f32 %v179_v32, %v172_v28 }
  0x2b   :  { %v181_v36 = vadd.f32 %v180_v34, %v173_v31 }
  0x2d   :  { %v182_v37 = vadd.f32 %v181_v36, %v174_v33 }
  0x2f   :  { %v183_v38 = vadd.f32 %v182_v37, %v175_v35 }
  0x31   :  { %190 = vst [vmem:[%s307_s2] sm:$0xff] %v183_v38 }

</bundles_post_ra>
